<compile_context>
chip_gen: v5e
topology: v5e:2x2
jax: 0.10.0
libtpu: 0.0.40
codegen_flags: <defaults>
</compile_context>

<pallas_src>
import jax
import jax.numpy as jnp
from jax.experimental import pallas as pl
from jax.experimental.pallas import tpu as pltpu


def mlp_critic_kernel(x_ref, w1_ref, b1_ref, w2_ref, b2_ref, w3_ref, b3_ref,
                      o_ref):
    # x_ref : (tb, obs_dim)  -- obs tile in native layout (batch on sublanes)
    # w1_ref: (h1, obs_dim)  b1_ref: (h1, 1)
    # w2_ref: (h2, h1)       b2_ref: (h2, 1)
    # w3_ref: (h2, 1)        b3_ref: (1, 1) scalar in SMEM
    # o_ref : (1, tb)        -- lane-dense value row for this batch tile

    # Put the batch on the 128-lane axis: transpose the small tile in-kernel
    # (XLU; off the binding slot) instead of a wrapper-side obs.T HBM pass.
    xT = jnp.transpose(x_ref[...])                       # (obs_dim, tb)

    # Hidden layer 1: Linear + Tanh -> (h1, tb)
    h1 = jnp.tanh(
        jnp.dot(w1_ref[...], xT, preferred_element_type=jnp.float32)
        + b1_ref[...]
    )
    # Hidden layer 2: Linear + Tanh -> (h2, tb)
    h2 = jnp.tanh(
        jnp.dot(w2_ref[...], h1, preferred_element_type=jnp.float32)
        + b2_ref[...]
    )
    # Output layer (out_features = 1): VPU multiply + sublane reduce; result
    # is already lane-dense (1, tb).
    v = jnp.sum(h2 * w3_ref[...], axis=0, keepdims=True) + b3_ref[0, 0]
    o_ref[...] = v.astype(o_ref.dtype)


def _choose_batch_tile(B):
    """Pick the per-step batch tile (lane width of one grid step)."""
    # Large tiles amortize the fixed per-grid-step pipeline overhead; VMEM is
    # a non-issue at these model sizes.  When the batch is small, shrink the
    # tile so the grid still has >= 2 roughly balanced steps, so both v7x
    # TensorCores get work under dimension_semantics=("parallel",).
    tb = 1024
    if B < 2 * tb:
        tb = max(128, ((B + 1) // 2 + 127) // 128 * 128)
    return tb


def mlp_critic_forward(obs, params, *, tb=None):
    """obs: [B, obs_dim] float32 -> returns [B] float32 (squeezed value)."""
    w1, b1, w2, b2, w3, b3 = params
    B, obs_dim = obs.shape
    h1 = w1.shape[0]
    h2 = w2.shape[0]

    if tb is None:
        tb = _choose_batch_tile(B)
    num_tiles = pl.cdiv(B, tb)

    n_param_elems = sum(int(p.size) for p in params)
    cost = pl.CostEstimate(
        flops=2 * B * (obs_dim * h1 + h1 * h2 + h2),
        transcendentals=B * (h1 + h2),
        bytes_accessed=4 * (B * obs_dim + B + n_param_elems),
    )

    out = pl.pallas_call(
        mlp_critic_kernel,
        out_shape=jax.ShapeDtypeStruct((1, B), jnp.float32),
        grid_spec=pltpu.PrefetchScalarGridSpec(
            num_scalar_prefetch=0,
            grid=(num_tiles,),
            in_specs=[
                pl.BlockSpec((tb, obs_dim), lambda i: (i, 0)),     # obs tile
                pl.BlockSpec((h1, obs_dim), lambda i: (0, 0)),     # W1 (resident)
                pl.BlockSpec((h1, 1), lambda i: (0, 0)),           # b1
                pl.BlockSpec((h2, h1), lambda i: (0, 0)),          # W2 (resident)
                pl.BlockSpec((h2, 1), lambda i: (0, 0)),           # b2
                pl.BlockSpec((h2, 1), lambda i: (0, 0)),           # W3 column
                pl.BlockSpec(memory_space=pltpu.MemorySpace.SMEM), # b3 scalar
            ],
            out_specs=pl.BlockSpec((1, tb), lambda i: (0, i)),
        ),
        compiler_params=pltpu.CompilerParams(
            dimension_semantics=("parallel",),   # megacore split on v7x
        ),
        cost_estimate=cost,
    )(obs, w1, b1, w2, b2, w3, b3)

    # (1, B) -> (B,); equals torch.squeeze(v_net(obs), -1).
    return out.reshape(B)


def init_params(key, obs_dim, hidden_sizes):
    """Deterministic init matching mlp([obs_dim]+hidden+[1]) shapes.

    Weights are stored PyTorch-style [out_features, in_features]; biases as
    [out_features, 1] columns.  The final layer weight is kept as the
    (h_last, 1) column view of the PyTorch (1, h_last) weight.
    """
    sizes = [obs_dim] + list(hidden_sizes) + [1]
    keys = jax.random.split(key, 2 * (len(sizes) - 1))
    params = []
    for j in range(len(sizes) - 1):
        fan_in, fan_out = sizes[j], sizes[j + 1]
        bound = 1.0 / jnp.sqrt(fan_in)
        w = jax.random.uniform(keys[2 * j], (fan_out, fan_in),
                               minval=-bound, maxval=bound, dtype=jnp.float32)
        b = jax.random.uniform(keys[2 * j + 1], (fan_out, 1),
                               minval=-bound, maxval=bound, dtype=jnp.float32)
        if j == len(sizes) - 2:
            w = w.T  # final layer kept as an (h_last, 1) column for the kernel
        params += [w, b]
    return tuple(params)


def reference_forward(obs, params):
    w1, b1, w2, b2, w3_col, b3 = params
    h1 = jnp.tanh(obs @ w1.T + b1.T)
    h2 = jnp.tanh(h1 @ w2.T + b2.T)
    v = h2 @ w3_col + b3            # (B, 1)
    return jnp.squeeze(v, axis=-1)  # torch.squeeze(v_net(obs), -1)


if __name__ == "__main__":
    obs_dim = 16
    hidden_sizes = (32, 32)

    key = jax.random.PRNGKey(0)
    k_params, k_obs = jax.random.split(key)
    params = init_params(k_params, obs_dim, hidden_sizes)

    # batch=384 -> tb=256, two grid steps with a partial last block (exercises
    # both v7x TCs + partial-block handling).  batch=100 -> single partial tile.
    for batch in (384, 100):
        obs = jax.random.normal(jax.random.fold_in(k_obs, batch),
                                (batch, obs_dim), dtype=jnp.float32)
        v = jax.block_until_ready(mlp_critic_forward(obs, params))
        v_ref = reference_forward(obs, params)
        assert v.shape == (batch,)
        assert jnp.allclose(v, v_ref, atol=1e-5, rtol=1e-4), (
            batch, float(jnp.max(jnp.abs(v - v_ref))))

    print("KERNEL_OK")
</pallas_src>

<mosaic_0001>
module attributes {stable_mosaic.version = 11 : i64} {
  func.func @mlp_critic_kernel(%arg0: i32, %arg1: memref<256x16xf32, #tpu.memory_space<vmem>>, %arg2: memref<32x16xf32, #tpu.memory_space<vmem>>, %arg3: memref<32x1xf32, #tpu.memory_space<vmem>>, %arg4: memref<32x32xf32, #tpu.memory_space<vmem>>, %arg5: memref<32x1xf32, #tpu.memory_space<vmem>>, %arg6: memref<32x1xf32, #tpu.memory_space<vmem>>, %arg7: memref<1x1xf32, #tpu.memory_space<smem>>, %arg8: memref<1x256xf32, #tpu.memory_space<vmem>>) attributes {dimension_semantics = [#tpu.dimension_semantics<parallel>], iteration_bounds = array<i64: 2>, scalar_prefetch = 0 : i64, scratch_operands = 0 : i64, tpu.core_type = #tpu.core_type<tc>, window_params = [{transform_indices = @transform_0, window_bounds = array<i64: 256, 16>}, {pipeline_mode = #tpu.pipeline_mode<synchronous>, transform_indices = @transform_1, window_bounds = array<i64: 32, 16>}, {pipeline_mode = #tpu.pipeline_mode<synchronous>, transform_indices = @transform_2, window_bounds = array<i64: 32, 1>}, {pipeline_mode = #tpu.pipeline_mode<synchronous>, transform_indices = @transform_3, window_bounds = array<i64: 32, 32>}, {pipeline_mode = #tpu.pipeline_mode<synchronous>, transform_indices = @transform_4, window_bounds = array<i64: 32, 1>}, {pipeline_mode = #tpu.pipeline_mode<synchronous>, transform_indices = @transform_5, window_bounds = array<i64: 32, 1>}, {transform_indices = @transform_6, window_bounds = array<i64: 1, 1>}, {transform_indices = @transform_7, window_bounds = array<i64: 1, 256>}]} {
    %c0 = arith.constant 0 : index
    %c0_0 = arith.constant 0 : index
    %0 = vector.load %arg1[%c0, %c0_0] : memref<256x16xf32, #tpu.memory_space<vmem>>, vector<256x16xf32>
    %1 = tpu.transpose %0, [1, 0] : vector<256x16xf32> -> vector<16x256xf32>
    %c0_1 = arith.constant 0 : index
    %c0_2 = arith.constant 0 : index
    %2 = vector.load %arg2[%c0_1, %c0_2] : memref<32x16xf32, #tpu.memory_space<vmem>>, vector<32x16xf32>
    %cst = arith.constant dense<0.000000e+00> : vector<32x256xf32>
    %3 = tpu.matmul %2, %1, %cst {dimension_numbers = #tpu.dot_dimension_numbers<[1], [0], [0], [1], [0, 0, 1, 1], [], []>} : vector<32x16xf32>, vector<16x256xf32>, vector<32x256xf32> -> vector<32x256xf32>
    %c0_3 = arith.constant 0 : index
    %c0_4 = arith.constant 0 : index
    %4 = vector.load %arg3[%c0_3, %c0_4] : memref<32x1xf32, #tpu.memory_space<vmem>>, vector<32x1xf32>
    %5 = vector.broadcast %4 : vector<32x1xf32> to vector<32x256xf32>
    %6 = arith.addf %3, %5 : vector<32x256xf32>
    %7 = math.tanh %6 : vector<32x256xf32>
    %c0_5 = arith.constant 0 : index
    %c0_6 = arith.constant 0 : index
    %8 = vector.load %arg4[%c0_5, %c0_6] : memref<32x32xf32, #tpu.memory_space<vmem>>, vector<32x32xf32>
    %cst_7 = arith.constant dense<0.000000e+00> : vector<32x256xf32>
    %9 = tpu.matmul %8, %7, %cst_7 {dimension_numbers = #tpu.dot_dimension_numbers<[1], [0], [0], [1], [0, 0, 1, 1], [], []>} : vector<32x32xf32>, vector<32x256xf32>, vector<32x256xf32> -> vector<32x256xf32>
    %c0_8 = arith.constant 0 : index
    %c0_9 = arith.constant 0 : index
    %10 = vector.load %arg5[%c0_8, %c0_9] : memref<32x1xf32, #tpu.memory_space<vmem>>, vector<32x1xf32>
    %11 = vector.broadcast %10 : vector<32x1xf32> to vector<32x256xf32>
    %12 = arith.addf %9, %11 : vector<32x256xf32>
    %13 = math.tanh %12 : vector<32x256xf32>
    %c0_10 = arith.constant 0 : index
    %c0_11 = arith.constant 0 : index
    %14 = vector.load %arg6[%c0_10, %c0_11] : memref<32x1xf32, #tpu.memory_space<vmem>>, vector<32x1xf32>
    %15 = vector.broadcast %14 : vector<32x1xf32> to vector<32x256xf32>
    %16 = arith.mulf %13, %15 : vector<32x256xf32>
    %cst_12 = arith.constant dense<0.000000e+00> : vector<256xf32>
    %17 = vector.multi_reduction <add>, %16, %cst_12 [0] : vector<32x256xf32> to vector<256xf32>
    %18 = vector.shape_cast %17 : vector<256xf32> to vector<1x256xf32>
    %c0_13 = arith.constant 0 : index
    %c0_14 = arith.constant 0 : index
    %19 = memref.load %arg7[%c0_13, %c0_14] : memref<1x1xf32, #tpu.memory_space<smem>>
    %20 = vector.broadcast %19 : f32 to vector<1x256xf32>
    %21 = arith.addf %18, %20 : vector<1x256xf32>
    %c0_15 = arith.constant 0 : index
    %c0_16 = arith.constant 0 : index
    %22 = vector.load %arg8[%c0_15, %c0_16] : memref<1x256xf32, #tpu.memory_space<vmem>>, vector<1x256xf32>
    tpu.vector_store %arg8[%c0_15, %c0_16], %21 {strides = array<i32>} : memref<1x256xf32, #tpu.memory_space<vmem>>, vector<1x256xf32>,
    return
  }
  func.func @transform_0(%arg0: i32) -> (i32, i32) {
    %c0_i32 = arith.constant 0 : i32
    %c0_i32_0 = arith.constant 0 : i32
    return %arg0, %c0_i32 : i32, i32
  }
  func.func @transform_1(%arg0: i32) -> (i32, i32) {
    %c0_i32 = arith.constant 0 : i32
    %c0_i32_0 = arith.constant 0 : i32
    %c0_i32_1 = arith.constant 0 : i32
    return %c0_i32, %c0_i32_0 : i32, i32
  }
  func.func @transform_2(%arg0: i32) -> (i32, i32) {
    %c0_i32 = arith.constant 0 : i32
    %c0_i32_0 = arith.constant 0 : i32
    %c0_i32_1 = arith.constant 0 : i32
    return %c0_i32, %c0_i32_0 : i32, i32
  }
  func.func @transform_3(%arg0: i32) -> (i32, i32) {
    %c0_i32 = arith.constant 0 : i32
    %c0_i32_0 = arith.constant 0 : i32
    %c0_i32_1 = arith.constant 0 : i32
    return %c0_i32, %c0_i32_0 : i32, i32
  }
  func.func @transform_4(%arg0: i32) -> (i32, i32) {
    %c0_i32 = arith.constant 0 : i32
    %c0_i32_0 = arith.constant 0 : i32
    %c0_i32_1 = arith.constant 0 : i32
    return %c0_i32, %c0_i32_0 : i32, i32
  }
  func.func @transform_5(%arg0: i32) -> (i32, i32) {
    %c0_i32 = arith.constant 0 : i32
    %c0_i32_0 = arith.constant 0 : i32
    %c0_i32_1 = arith.constant 0 : i32
    return %c0_i32, %c0_i32_0 : i32, i32
  }
  func.func @transform_6(%arg0: i32) -> (i32, i32) {
    %c0_i32 = arith.constant 0 : i32
    %c0_i32_0 = arith.constant 0 : i32
    %c0_i32_1 = arith.constant 0 : i32
    return %c0_i32, %c0_i32_0 : i32, i32
  }
  func.func @transform_7(%arg0: i32) -> (i32, i32) {
    %c0_i32 = arith.constant 0 : i32
    %c0_i32_0 = arith.constant 0 : i32
    return %c0_i32, %arg0 : i32, i32
  }
}

</mosaic_0001>

<bundles_post_ra>
// kernel: tpu_custom_call.1
= control target key start
LH: loop header
LB: loop body
LE: loop exit
PB: predicated region body
PF: predicated region fallthrough
CT: control target
= control target key end

     0   :  { %s1299_s0 = inlined_call_operand.vmem [shape: f32[384,16], index: 0, kind: input, shape index: {}]   ;;  %s1300_s1 = inlined_call_operand.vmem [shape: f32[32,16], index: 1, kind: input, shape index: {}]   ;;  %s1301_s2 = inlined_call_operand.vmem [shape: f32[32,1], index: 2, kind: input, shape index: {}]   ;;  %s1302_s3 = inlined_call_operand.vmem [shape: f32[32,32], index: 3, kind: input, shape index: {}]   ;;  %s1303_s4 = inlined_call_operand.vmem [shape: f32[32,1], index: 4, kind: input, shape index: {}]   ;;  %s1304_s5 = inlined_call_operand.vmem [shape: f32[32,1], index: 5, kind: input, shape index: {}]   ;;  %s1305_s6 = inlined_call_operand.<no memory space> [shape: f32[1,1], index: 6, kind: input, shape index: {}]   ;;  %s1306_s7 = inlined_call_operand.hbm [shape: f32[1,384], index: 7, kind: output, shape index: {}]  }
   0x1   :  { %12 = sst [smem:[#allocation2]] %s1305_s6 }
   0x2   :  { %13 = vsyncpa [#allocation4], 0 }
   0x3   :  { %15 = vsyncpa [#allocation4 + $0x1], 0  ;;  %s1045_s26 = smov 0   ;;  %s1047_s27 = smov 0  }
   0x4   :  { %s1049_s28 = smov 0   ;;  %s1051_s29 = smov 0  }
   0x5 LB: > { %s1066_s6 = sadd.s32 4294967295, %s998_s29   ;;  %s791_s30 = sadd.s32 4294967294, %s998_s29   ;;  %s998_s29 = sphi %s1051_s29, %s1312_s29   ;;  %s994_s28 = sphi %s1049_s28, %s1311_s28   ;;  %s990_s27 = sphi %s1047_s27, %s1310_s27   ;;  %s986_s26 = sphi %s1045_s26, %s1309_s26  }
   0x6   : > { %s1070_s8 = sadd.s32 1, %s998_s29   ;;  %s180_s9 = sadd.s32 1, %s994_s28 }
   0x7   : > { %s177_s10 = ssub.s32 %s998_s29, %s1070_s8  ;;  %p190_p0 = scmp.ne.s32.totalorder %s994_s28, %s990_s27 }
   0x8   : > { %p178_p1 = scmp.eq.s32.totalorder %s177_s10, 0  ;;  %p191_p2 = scmp.eq.s32.totalorder %s1066_s6, 1 }
   0x9   : > { %p196_p3 = scmp.ne.s32.totalorder %s990_s27, %s986_s26  ;;  %p197_p4 = scmp.eq.s32.totalorder %s791_s30, 1 }
   0xa   : > { %s1081_s11 = scalar_select %p178_p1, %s994_s28, %s180_s9  }
   0xb   : > { %p1083_p5 = por %p191_p2, %p190_p0  ;;  %p1087_p6 = por %p197_p4, %p196_p3 }
   0xc   : > { %p794_p7 = scmp.ge.s32.totalorder %s998_s29, 1  ;;  %p250_p8 = scmp.lt.s32.totalorder %s998_s29, 3 }
   0xe   : > { %p251_p9 = pnand %p794_p7, %p250_p8 }
   0xf   : > { %s796_s14 = sshll.u32 (!%p251_p9), %s1066_s6, 5 }
  0x10   : > { %254 = sbr.rel (%p251_p9) target bundleno = 471 (0x1d7), region = 48  ;;  %p291_p10 = scmp.lt.s32.totalorder (!%p251_p9), %s796_s14, 47 }
  0x15   : > { %s1314_s14 = smov (!%p291_p10, %s796_s14), 47  ;;  %vm364_vm0 = vcmask 130048   ;;  %v341_v18 = vld [vmem:[%s1301_s2 + $0x8] sm:$0xff]  ;;  %v343_v19 = vld [vmem:[%s1301_s2 + $0x18] sm:$0xff]  ;;  %v1000_v22 = vmov 0   ;;  %v340_v25 = vld [vmem:[%s1301_s2] sm:$0xff] }
  0x16   : > { %s797_s15 = sshll.u32 %s1314_s14, 3  ;;  %891 = vset.pattern.permute.xlu1 %v1000_v22  ;;  %890 = vset.pattern.permute.xlu0 %v1000_v22  ;;  %v342_v26 = vld [vmem:[%s1301_s2 + $0x10] sm:$0xff]  ;;  %v546_v36 = vld [vmem:[%s1303_s4 + $0x18] sm:$0xff]  ;;  %v647_v37 = vld [vmem:[%s1304_s5 + $0x8] sm:$0xff]  ;;  %vm567_vm1 = vcmask 261120   ;;  %s283_s14 = sand.u32 1, %s990_s27  }
  0x17   : > { %s1097_s18 = scalar_lea.vmem %s1299_s0, %s797_s15  ;;  %351 = vperm.xlu1 %891, %v341_v18   ;;  %361 = vperm.xlu0 %890, %v343_v19   ;;  %v545_v31 = vld [vmem:[%s1303_s4 + $0x10] sm:$0xff]  ;;  %v336_v40 = vld [vmem:[%s1300_s1] sm:$0xff]  ;;  %v337_v42 = vld [vmem:[%s1300_s1 + $0x8] sm:$0xff]  ;;  %s696_s15 = sld [smem:[#allocation2]]  ;;  %vm703_vm2 = vcmask 1040384  }
  0x18   : > { %v319_v0 = vld [vmem:[%s1097_s18 + $0x78] sm:$0xff]  ;;  %v318_v2 = vld [vmem:[%s1097_s18 + $0x70] sm:$0xff]  ;;  %v317_v4 = vld [vmem:[%s1097_s18 + $0x68] sm:$0xff]  ;;  %892 = vset.pattern.permute.xlu2 %v1000_v22  ;;  %s795_s16 = sshll.u32 %s283_s14, 1  ;;  %s1244_s19 = scalar_lea.sflag [#allocation4], %s283_s14 }
  0x19   : > { %v335_v1 = vld [vmem:[%s1097_s18 + $0xf8] sm:$0xff]  ;;  %798 = vmatpush.xpose.msk.msra.mxu0 %vm364_vm0, %v319_v0  ;;  %v334_v3 = vld [vmem:[%s1097_s18 + $0xf0] sm:$0xff]  ;;  %v333_v5 = vld [vmem:[%s1097_s18 + $0xe8] sm:$0xff]  ;;  %s285_s17 = scalar_lea.vmem [#allocation3], %s795_s16  ;;  %s847_s20 = sshll.u32 (%p1083_p5), %s1066_s6, 1 }
  0x1a   : > { %818 = vmatpush.xpose.msk.msra.mxu1 %vm364_vm0, %v335_v1  ;;  %v316_v6 = vld [vmem:[%s1097_s18 + $0x60] sm:$0xff]  ;;  %v315_v8 = vld [vmem:[%s1097_s18 + $0x58] sm:$0xff]  ;;  %v314_v10 = vld [vmem:[%s1097_s18 + $0x50] sm:$0xff]  ;;  %s720_s21 = ssub.s32 (%p1083_p5), 3, %s847_s20 }
  0x1b   : > { %v332_v7 = vld [vmem:[%s1097_s18 + $0xe0] sm:$0xff]  ;;  %v331_v9 = vld [vmem:[%s1097_s18 + $0xd8] sm:$0xff]  ;;  %v330_v11 = vld [vmem:[%s1097_s18 + $0xd0] sm:$0xff]  ;;  %p721_p11 = scmp.lt.s32.totalorder (%p1083_p5), %s720_s21, 2 }
  0x1c   : > { %v313_v12 = vld [vmem:[%s1097_s18 + $0x48] sm:$0xff]  ;;  %v312_v14 = vld [vmem:[%s1097_s18 + $0x40] sm:$0xff]  ;;  %v311_v16 = vld [vmem:[%s1097_s18 + $0x38] sm:$0xff] }
  0x1d   : > { %799 = vmatpush.xpose.msk.msra.mxu0 %vm364_vm0, %v318_v2  ;;  %v329_v13 = vld [vmem:[%s1097_s18 + $0xc8] sm:$0xff]  ;;  %v328_v15 = vld [vmem:[%s1097_s18 + $0xc0] sm:$0xff]  ;;  %v327_v17 = vld [vmem:[%s1097_s18 + $0xb8] sm:$0xff] }
  0x1e   : > { %819 = vmatpush.xpose.msk.msra.mxu1 %vm364_vm0, %v334_v3  ;;  %v310_v20 = vld [vmem:[%s1097_s18 + $0x30] sm:$0xff]  ;;  %v309_v23 = vld [vmem:[%s1097_s18 + $0x28] sm:$0xff]  ;;  %v308_v27 = vld [vmem:[%s1097_s18 + $0x20] sm:$0xff] }
  0x1f   : > { %v326_v21 = vld [vmem:[%s1097_s18 + $0xb0] sm:$0xff]  ;;  %v325_v24 = vld [vmem:[%s1097_s18 + $0xa8] sm:$0xff]  ;;  %v324_v28 = vld [vmem:[%s1097_s18 + $0xa0] sm:$0xff]  ;;  %346 = vperm.xlu1 %891, %v340_v25   ;;  %356 = vperm.xlu0 %890, %v342_v26  }
  0x20   : > { %v307_v29 = vld [vmem:[%s1097_s18 + $0x18] sm:$0xff]  ;;  %v306_v32 = vld [vmem:[%s1097_s18 + $0x10] sm:$0xff]  ;;  %v305_v34 = vld [vmem:[%s1097_s18 + $0x8] sm:$0xff] }
  0x21   : > { %800 = vmatpush.xpose.msk.msra.mxu0 %vm364_vm0, %v317_v4  ;;  %v323_v30 = vld [vmem:[%s1097_s18 + $0x98] sm:$0xff]  ;;  %v322_v33 = vld [vmem:[%s1097_s18 + $0x90] sm:$0xff]  ;;  %v321_v35 = vld [vmem:[%s1097_s18 + $0x88] sm:$0xff] }
  0x22   : > { %820 = vmatpush.xpose.msk.msra.mxu1 %vm364_vm0, %v333_v5  ;;  %v304_v38 = vld [vmem:[%s1097_s18] sm:$0xff]  ;;  %v648_v41 = vld [vmem:[%s1304_s5 + $0x10] sm:$0xff]  ;;  %v339_v44 = vld [vmem:[%s1300_s1 + $0x18] sm:$0xff] }
  0x23   : > { %v320_v39 = vld [vmem:[%s1097_s18 + $0x80] sm:$0xff]  ;;  %v338_v43 = vld [vmem:[%s1300_s1 + $0x10] sm:$0xff] }
  0x24   : > { %v543_v3 = vld [vmem:[%s1303_s4] sm:$0xff] }
  0x25   : > { %801 = vmatpush.xpose.msk.msra.mxu0 %vm364_vm0, %v316_v6  ;;  %549 = vperm.xlu2 %892, %v543_v3  }
  0x26   : > { %821 = vmatpush.xpose.msk.msra.mxu1 %vm364_vm0, %v332_v7 }
  0x27   : > { %559 = vperm.xlu0 %890, %v545_v31   ;;  %564 = vperm.xlu1 %891, %v546_v36  }
  0x29   : > { %802 = vmatpush.xpose.msk.msra.mxu0 %vm364_vm0, %v315_v8  ;;  %v539_v8 = vld [vmem:[%s1302_s3] sm:$0xff] }
  0x2a   : > { %822 = vmatpush.xpose.msk.msra.mxu1 %vm364_vm0, %v331_v9 }
  0x2d   : > { %803 = vmatpush.xpose.msk.msra.mxu0 %vm364_vm0, %v314_v10 }
  0x2e   : > { %823 = vmatpush.xpose.msk.msra.mxu1 %vm364_vm0, %v330_v11  ;;  %v544_v11 = vld [vmem:[%s1303_s4 + $0x8] sm:$0xff] }
  0x2f   : > { %657 = vperm.xlu0 %890, %v647_v37   ;;  %662 = vperm.xlu1 %891, %v648_v41  }
  0x30   : > { %554 = vperm.xlu2 %892, %v544_v11  }
  0x31   : > { %804 = vmatpush.xpose.msk.msra.mxu0 %vm364_vm0, %v313_v12  ;;  %v540_v12 = vld [vmem:[%s1302_s3 + $0x8] sm:$0xff] }
  0x32   : > { %824 = vmatpush.xpose.msk.msra.mxu1 %vm364_vm0, %v329_v13  ;;  %v646_v13 = vld [vmem:[%s1304_s5] sm:$0xff] }
  0x35   : > { %805 = vmatpush.xpose.msk.msra.mxu0 %vm364_vm0, %v312_v14  ;;  %v541_v14 = vld [vmem:[%s1302_s3 + $0x10] sm:$0xff] }
  0x36   : > { %825 = vmatpush.xpose.msk.msra.mxu1 %vm364_vm0, %v328_v15  ;;  %v649_v15 = vld [vmem:[%s1304_s5 + $0x18] sm:$0xff] }
  0x38   : > { %652 = vperm.xlu2 %892, %v646_v13  }
  0x39   : > { %806 = vmatpush.xpose.msk.msra.mxu0 %vm364_vm0, %v311_v16  ;;  %v542_v16 = vld [vmem:[%s1302_s3 + $0x18] sm:$0xff] }
  0x3a   : > { %826 = vmatpush.xpose.msk.msra.mxu1 %vm364_vm0, %v327_v17 }
  0x3d   : > { %807 = vmatpush.xpose.msk.msra.mxu0 %vm364_vm0, %v310_v20 }
  0x3e   : > { %827 = vmatpush.xpose.msk.msra.mxu1 %vm364_vm0, %v326_v21 }
  0x40   : > { %667 = vperm.xlu2 %892, %v649_v15  }
  0x41   : > { %808 = vmatpush.xpose.msk.msra.mxu0 %vm364_vm0, %v309_v23 }
  0x42   : > { %828 = vmatpush.xpose.msk.msra.mxu1 %vm364_vm0, %v325_v24 }
  0x45   : > { %809 = vmatpush.xpose.msk.msra.mxu0 %vm364_vm0, %v308_v27 }
  0x46   : > { %829 = vmatpush.xpose.msk.msra.mxu1 %vm364_vm0, %v324_v28 }
  0x49   : > { %810 = vmatpush.xpose.msk.msra.mxu0 %vm364_vm0, %v307_v29 }
  0x4a   : > { %830 = vmatpush.xpose.msk.msra.mxu1 %vm364_vm0, %v323_v30 }
  0x4d   : > { %811 = vmatpush.xpose.msk.msra.mxu0 %vm364_vm0, %v306_v32 }
  0x4e   : > { %831 = vmatpush.xpose.msk.msra.mxu1 %vm364_vm0, %v322_v33 }
  0x51   : > { %812 = vmatpush.xpose.msk.msra.mxu0 %vm364_vm0, %v305_v34 }
  0x52   : > { %832 = vmatpush.xpose.msk.msra.mxu1 %vm364_vm0, %v321_v35 }
  0x55   : > { %813 = vmatpush.xpose.msk.msra.mxu0 %vm364_vm0, %v304_v38 }
  0x56   : > { %833 = vmatpush.xpose.msk.msra.mxu1 %vm364_vm0, %v320_v39 }
  0x58   : > { %814 = vmatmul.msk.f32.vlgmr.msra.gmra.mxu0 %vm364_vm0, %v336_v40 }
  0x59   : > { %834 = vmatmul.msk.f32.vlgmr.msra.gmra.mxu1 %vm364_vm0, %v336_v40 }
  0x60   : > { %815 = vmatmul.msk.f32.gmra.mxu0 %vm364_vm0, %v337_v42 }
  0x61   : > { %835 = vmatmul.msk.f32.gmra.mxu1 %vm364_vm0, %v337_v42 }
  0x68   : > { %816 = vmatmul.msk.f32.gmra.mxu0 %vm364_vm0, %v338_v43 }
  0x69   : > { %836 = vmatmul.msk.f32.gmra.mxu1 %vm364_vm0, %v338_v43 }
  0x70   : > { %817 = vmatmul.msk.f32.gmra.mxu0 %vm364_vm0, %v339_v44 }
  0x71   : > { %837 = vmatmul.msk.f32.gmra.mxu1 %vm364_vm0, %v339_v44 }
  0x7f   : > { %v550_v19 = vpop.permute.xlu2 %549 }
  0x89   : > { %v362_v49 = vpop.permute.xlu0 %361  ;;  %v352_v52 = vpop.permute.xlu1 %351 }
  0x8a   : > { %v555_v22 = vpop.permute.xlu2 %554 }
  0x91   : > { %v357_v53 = vpop.permute.xlu0 %356  ;;  %v347_v60 = vpop.permute.xlu1 %346 }
  0x92   : > { %v653_v34 = vpop.permute.xlu2 %652 }
  0x99   : > { %v560_v26 = vpop.permute.xlu0 %559  ;;  %v565_v32 = vpop.permute.xlu1 %564 }
  0xa1   : > { %v658_v43 = vpop.permute.xlu0 %657 }
  0xd5   : > { %v490_v45 = vpop.f32.mrf.mxu0 }
  0xd6   : > { %v519_v46 = vpop.f32.mrf.mxu1  ;;  %v491_v63 = vadd.f32 %v490_v45, %v347_v60 }
  0xd7   : > { %v520_v0 = vadd.f32 %v519_v46, %v347_v60  ;;  %v663_v46 = vpop.permute.xlu1 %662 }
  0xdd   : > { %v493_v47 = vpop.f32.mrf.mxu0 }
  0xde   : > { %v522_v48 = vpop.f32.mrf.mxu1  ;;  %v494_v61 = vadd.f32 %v493_v47, %v352_v52 }
  0xdf   : > { %v523_v62 = vadd.f32 %v522_v48, %v352_v52 }
  0xe5   : > { %v496_v50 = vpop.f32.mrf.mxu0 }
  0xe6   : > { %v525_v51 = vpop.f32.mrf.mxu1  ;;  %v497_v56 = vadd.f32 %v496_v50, %v357_v53 }
  0xe7   : > { %v526_v59 = vadd.f32 %v525_v51, %v357_v53 }
  0xed   : > { %v499_v54 = vpop.f32.mrf.mxu0 }
  0xee   : > { %v528_v55 = vpop.f32.mrf.mxu1  ;;  %v500_v57 = vadd.f32 %v499_v54, %v362_v49 }
  0xef   : > { %v529_v58 = vadd.f32 %v528_v55, %v362_v49  ;;  %v668_v55 = vpop.permute.xlu2 %667 }
  0xf0   : > { %893 = vtanh.f32 %v500_v57 }
  0xf1   : > { %895 = vtanh.f32 %v529_v58 }
  0xf2   : > { %897 = vtanh.f32 %v497_v56 }
  0xf3   : > { %899 = vtanh.f32 %v526_v59 }
  0xf4   : > { %901 = vtanh.f32 %v494_v61 }
  0xf5   : > { %903 = vtanh.f32 %v523_v62 }
  0xf6   : > { %v894_v1 = vpop.eup %893  ;;  %905 = vtanh.f32 %v491_v63 }
  0xf7   : > { %v896_v2 = vpop.eup %895  ;;  %907 = vtanh.f32 %v520_v0  ;;  %592 = vmatpush.msra.mxu2 %v894_v1 }
  0xf8   : > { %v898_v4 = vpop.eup %897  ;;  %621 = vmatpush.msra.mxu3 %v896_v2 }
  0xf9   : > { %v900_v5 = vpop.eup %899  ;;  %593 = vmatpush.msra.mxu2 %v898_v4 }
  0xfa   : > { %v902_v6 = vpop.eup %901  ;;  %622 = vmatpush.msra.mxu3 %v900_v5 }
  0xfb   : > { %v904_v7 = vpop.eup %903  ;;  %594 = vmatpush.msra.mxu2 %v902_v6 }
  0xfc   : > { %v906_v9 = vpop.eup %905  ;;  %623 = vmatpush.msra.mxu3 %v904_v7 }
  0xfd   : > { %v908_v10 = vpop.eup %907  ;;  %595 = vmatpush.msra.mxu2 %v906_v9  ;;  %v697_v9 = vstv %s696_s15 }
  0xfe   : > { %624 = vmatpush.msra.mxu3 %v908_v10  ;;  %838 = vmatmul.msk.f32.vlgmr.msra.gmra.mxu2 %vm567_vm1, %v539_v8 }
  0xff   : > { %842 = vmatmul.msk.f32.vlgmr.msra.gmra.mxu3 %vm567_vm1, %v539_v8 }
 0x106   : > { %839 = vmatmul.msk.f32.gmra.mxu2 %vm567_vm1, %v540_v12 }
 0x107   : > { %843 = vmatmul.msk.f32.gmra.mxu3 %vm567_vm1, %v540_v12  ;;  %v706_v12 = vlaneseq }
 0x109   : > { %vm708_vm3 = vcmp.lt.s32.totalorder %v706_v12, 256 }
 0x10e   : > { %840 = vmatmul.msk.f32.gmra.mxu2 %vm567_vm1, %v541_v14 }
 0x10f   : > { %844 = vmatmul.msk.f32.gmra.mxu3 %vm567_vm1, %v541_v14 }
 0x116   : > { %841 = vmatmul.msk.f32.gmra.mxu2 %vm567_vm1, %v542_v16 }
 0x117   : > { %845 = vmatmul.msk.f32.gmra.mxu3 %vm567_vm1, %v542_v16 }
 0x181   : > { %v597_v17 = vpop.f32.mrf.mxu2 }
 0x182   : > { %v626_v18 = vpop.f32.mrf.mxu3  ;;  %v598_v23 = vadd.f32 %v597_v17, %v550_v19 }
 0x183   : > { %v627_v24 = vadd.f32 %v626_v18, %v550_v19 }
 0x184   : > { %909 = vtanh.f32 %v598_v23 }
 0x185   : > { %911 = vtanh.f32 %v627_v24 }
 0x189   : > { %v600_v20 = vpop.f32.mrf.mxu2 }
 0x18a   : > { %v629_v21 = vpop.f32.mrf.mxu3  ;;  %v601_v25 = vadd.f32 %v600_v20, %v555_v22  ;;  %v910_v33 = vpop.eup %909 }
 0x18b   : > { %v630_v27 = vadd.f32 %v629_v21, %v555_v22  ;;  %v912_v35 = vpop.eup %911  ;;  %v670_v48 = vmul.f32 %v910_v33, %v653_v34 }
 0x18c   : > { %913 = vtanh.f32 %v601_v25  ;;  %v671_v50 = vmul.f32 %v912_v35, %v653_v34 }
 0x18d   : > { %915 = vtanh.f32 %v630_v27 }
 0x191   : > { %v603_v28 = vpop.f32.mrf.mxu2 }
 0x192   : > { %v604_v29 = vadd.f32 %v603_v28, %v560_v26  ;;  %v632_v30 = vpop.f32.mrf.mxu3  ;;  %v914_v37 = vpop.eup %913 }
 0x193   : > { %v633_v31 = vadd.f32 %v632_v30, %v560_v26  ;;  %v916_v40 = vpop.eup %915  ;;  %v672_v45 = vmul.f32 %v914_v37, %v658_v43 }
 0x194   : > { %917 = vtanh.f32 %v604_v29  ;;  %v673_v47 = vmul.f32 %v916_v40, %v658_v43 }
 0x195   : > { %919 = vtanh.f32 %v633_v31  ;;  %v678_v52 = vadd.f32 %v672_v45, %v670_v48 }
 0x196   : > { %v687_v54 = vadd.f32 %v673_v47, %v671_v50 }
 0x199   : > { %v606_v36 = vpop.f32.mrf.mxu2 }
 0x19a   : > { %v607_v38 = vadd.f32 %v606_v36, %v565_v32  ;;  %v635_v39 = vpop.f32.mrf.mxu3  ;;  %v918_v42 = vpop.eup %917 }
 0x19b   : > { %v636_v41 = vadd.f32 %v635_v39, %v565_v32  ;;  %v920_v44 = vpop.eup %919  ;;  %v674_v49 = vmul.f32 %v918_v42, %v663_v46 }
 0x19c   : > { %921 = vtanh.f32 %v607_v38  ;;  %v675_v51 = vmul.f32 %v920_v44, %v663_v46 }
 0x19d   : > { %923 = vtanh.f32 %v636_v41  ;;  %v679_v57 = vadd.f32 %v678_v52, %v674_v49 }
 0x19e   : > { %v688_v59 = vadd.f32 %v687_v54, %v675_v51 }
 0x1a2   : > { %v922_v53 = vpop.eup %921 }
 0x1a3   : > { %v924_v56 = vpop.eup %923  ;;  %v676_v58 = vmul.f32 %v922_v53, %v668_v55 }
 0x1a4   : > { %v677_v60 = vmul.f32 %v924_v56, %v668_v55 }
 0x1a5   : > { %v680_v61 = vadd.f32 %v679_v57, %v676_v58 }
 0x1a6   : > { %v689_v62 = vadd.f32 %v688_v59, %v677_v60 }
 0x1a7   : > { %v681_v63 = vrot.slane %v680_v61, 4 }
 0x1a8   : > { %v690_v0 = vrot.slane %v689_v62, 4 }
 0x1a9   : > { %v682_v1 = vadd.f32 %v681_v63, %v680_v61 }
 0x1aa   : > { %v691_v2 = vadd.f32 %v690_v0, %v689_v62 }
 0x1ab   : > { %v683_v3 = vrot.slane %v682_v1, 2 }
 0x1ac   : > { %v692_v4 = vrot.slane %v691_v2, 2 }
 0x1ad   : > { %v684_v5 = vadd.f32 %v683_v3, %v682_v1 }
 0x1ae   : > { %v693_v6 = vadd.f32 %v692_v4, %v691_v2 }
 0x1af   : > { %v685_v7 = vrot.slane %v684_v5, 1 }
 0x1b0   : > { %v694_v8 = vrot.slane %v693_v6, 1 }
 0x1b1   : > { %v686_v10 = vadd.f32 %v685_v7, %v684_v5 }
 0x1b2   : > { %v695_v11 = vadd.f32 %v694_v8, %v693_v6 }
 0x1b3   : > { %v698_v14 = vadd.f32 %v697_v9, %v686_v10 }
 0x1b4   : > { %v699_v13 = vadd.f32 %v697_v9, %v695_v11 }
 0x1b5   : > { %718 = sbr.rel (!%p1083_p5) target bundleno = 471 (0x1d7), region = 52 }
 0x1b6   : > { %v702_v15 = vrot.slane %v699_v13, 7 }
 0x1b8   : > { %v704_v16 = vsel %vm703_vm2, %v698_v14, %v702_v15 }
 0x1b9   : > { %710 = vst.msk [vmem:[%s285_s17] sm:$0x3] %vm708_vm3, %v704_v16 }
 0x1ba   : > { %s1316_s21 = smov (!%p721_p11, %s720_s21), 2 }
 0x1bb   : > { %s723_s22 = ssub.s32 2, %s1316_s21 }
 0x1bc   : > { %s724_s18 = sshll.u32 %s723_s22, 4 }
 0x1bd   : > { %725 = vsyncadd %s1244_s19, %s724_s18  ;;  %p848_p12 = scmp.ne.s32.totalorder %s1316_s21, 0  ;;  %s727_s12 = scalar_lea.hbm %s1306_s7, %s847_s20 }
 0x1be   : > { %s728_s25 = sshll.u32 %s1316_s21, 4  ;;  %s1258_s30 = sshll.u32 %s285_s17, 4  ;;  %s730_s30 = int_to_ptr.vmem [resolvable:$true] %s1258_s30 }
 0x1bf   : > { %s731_s6 = sshll.u32 %s727_s12, 4  ;;  %s925_s9 = sshra.s32 %s730_s30, 4  ;;  %s732_s6 = int_to_ptr.hbm [resolvable:$true] %s731_s6  ;;  %s926_s9 = int_to_ptr.vmem [resolvable:$true] %s925_s9 }
 0x1c0   : > { %s927_s10 = sshrl.u32 %s728_s25, 4  ;;  %s1001_s15 = smov [#allocation3]  }
 0x1c1   : > { %s932_s14 = scalar_lea.vmem %s926_s9, %s927_s10  ;;  %s936_s16 = scalar_lea.vmem %s1001_s15, 4 }
 0x1c2   : > { %p933_p13 = scmp.ne.s32.totalorder %s926_s9, %s932_s14  ;;  %p938_p2 = scmp.lt.s32.totalorder %s936_s16, %s932_s14 }
 0x1c4   : > { %p934_p0 = pnand %p933_p13, %p848_p12 }
 0x1c6   : > { %p935_p1 = pneg %p934_p0 }
 0x1c8   : > { %p940_p3 = pnand %p938_p2, %p935_p1 }
 0x1ca   : > { %943 = shalt.err (!%p940_p3)
}
 0x1cb   : > { %s944_s17 = sshra.s32 %s732_s6, 4  ;;  %s955_s23 = scalar_lea.hbm %s1306_s7, 3  ;;  %s945_s17 = int_to_ptr.hbm [resolvable:$true] %s944_s17 }
 0x1cc   : > { %s951_s20 = scalar_lea.hbm %s945_s17, %s927_s10  ;;  %p956_p8 = scmp.lt.s32.totalorder %s945_s17, %s1306_s7 }
 0x1cd   : > { %p952_p4 = scmp.ne.s32.totalorder %s945_s17, %s951_s20  ;;  %p957_p9 = scmp.lt.s32.totalorder %s955_s23, %s951_s20 }
 0x1cf   : > { %p953_p5 = pnand %p952_p4, %p848_p12  ;;  %p958_p10 = por %p957_p9, %p956_p8 }
 0x1d1   : > { %p954_p7 = pneg %p953_p5 }
 0x1d3   : > { %p959_p11 = pnand %p958_p10, %p954_p7 }
 0x1d5   : > { %962 = shalt.err (!%p959_p11)
}
 0x1d6   : > { %734 = dma.vmem_to_hbm [thread:$0]  (%p848_p12), %s730_s30, %s728_s25, %s732_s6, %s1244_s19  }
 0x1d7 PF: > { %p856_p13 = scmp.ge.s32.totalorder %s998_s29, 2  ;;  %s743_s9 = sand.u32 1, %s986_s26  }
 0x1d8   : > { %s744_s10 = scalar_lea.sflag [#allocation4], %s743_s9 }
 0x1d9   : > { %p853_p0 = pnand %p856_p13, %p1087_p6 }
 0x1db   : > { %p854_p1 = pneg %p853_p0 }
 0x1dd   : > { %981 = dma.done.wait (%p854_p1), %s744_s10, 32  }
 0x1de   : > { %983 = vsyncadd (%p854_p1), %s744_s10, 4294967264  ;;  %p18_p2 = scmp.ge.s32.totalorder %s1070_s8, 4   ;;  %s1309_s26 = smov %s990_s27 }
 0x1df   : > { %s1310_s27 = smov %s994_s28  ;;  %s1311_s28 = smov %s1081_s11 }
 0x1e0   : > { %s1312_s29 = smov %s1070_s8  ;;  %20 = sbr.rel (!%p18_p2) target bundleno = 5 (0x5), region = 83 }
 0x1e5   :  { %750 = vsyncpa [#allocation4], 1 }
 0x1e6   :  { %752 = vsyncpa [#allocation4 + $0x1], 1 }

</bundles_post_ra>
